<compile_context>
chip_gen: v7x
topology: tpu7x:2x2x1
jax: 0.10.0
libtpu: 0.0.40
codegen_flags: <defaults>
</compile_context>

<pallas_src>
import functools

import jax
import jax.numpy as jnp
from jax.experimental import pallas as pl
from jax.experimental.pallas import tpu as pltpu


_LANE_CHOICES = (1024, 512, 256, 128)          # lane-dense last dim candidates
_TARGET_BLOCK_BYTES = 2 * 1024 * 1024          # ~2 MiB / operand buffer (~85% roofline)


def _bce_ls_kernel(prob_ref, tgt_ref, loss_ref, *, a, b):
    # a = 1 - label_smoothing, b = 0.5 * label_smoothing (trace-time floats)
    o = prob_ref[...].astype(jnp.float32)
    t = tgt_ref[...].astype(jnp.float32) * a + b           # fused label smoothing
    log_o = jnp.maximum(jnp.log(o), -100.0)                 # PyTorch clamp
    log_1mo = jnp.maximum(jnp.log(1.0 - o), -100.0)
    loss = -(t * log_o + (1.0 - t) * log_1mo)
    loss_ref[...] = loss.astype(loss_ref.dtype)


def label_smoothing_bce(output, target, label_smoothing, *,
                        max_block_rows=None, alias_output=False):
    """Elementwise BCE-with-label-smoothing loss (reduction='none')."""
    assert output.shape == target.shape
    orig_shape = output.shape
    out_dtype = output.dtype
    total = output.size

    # ---- pick a lane-dense layout that avoids any wrapper-side copy when possible
    lanes = 128
    for cand in _LANE_CHOICES:
        if total % cand == 0:
            lanes = cand
            break
    pad = (-total) % lanes                     # 0 unless numel is not a multiple of 128
    rows = (total + pad) // lanes

    itemsize = max(jnp.dtype(output.dtype).itemsize, jnp.dtype(target.dtype).itemsize)
    blk = max(8, (_TARGET_BLOCK_BYTES // (lanes * itemsize)) // 8 * 8)
    if max_block_rows is not None:
        blk = max(8, min(blk, (max_block_rows // 8) * 8 or max_block_rows))
    if blk >= rows:
        blk = rows                             # single full-extent block (always legal)

    flat_o = output.reshape(-1)
    flat_t = target.reshape(-1)
    if pad:
        # pad probabilities with 0.5 so logs stay finite in the dead tail
        flat_o = jnp.pad(flat_o, (0, pad), constant_values=0.5)
        flat_t = jnp.pad(flat_t, (0, pad), constant_values=0)

    o2d = flat_o.reshape(rows, lanes)          # native dtype, bitcast reshape
    t2d = flat_t.reshape(rows, lanes)

    kernel = functools.partial(
        _bce_ls_kernel,
        a=float(1.0 - label_smoothing),
        b=float(0.5 * label_smoothing),
    )

    extra = {}
    if alias_output and pad == 0 and o2d.dtype == out_dtype:
        # reuse the probability buffer for the loss (caller must donate it)
        extra["input_output_aliases"] = {0: 0}

    loss2d = pl.pallas_call(
        kernel,
        out_shape=jax.ShapeDtypeStruct((rows, lanes), out_dtype),
        grid_spec=pltpu.PrefetchScalarGridSpec(
            num_scalar_prefetch=0,
            grid=(pl.cdiv(rows, blk),),        # ragged last block handled by Pallas
            in_specs=[
                pl.BlockSpec((blk, lanes), lambda i: (i, 0)),
                pl.BlockSpec((blk, lanes), lambda i: (i, 0)),
            ],
            out_specs=pl.BlockSpec((blk, lanes), lambda i: (i, 0)),
        ),
        compiler_params=pltpu.CompilerParams(
            dimension_semantics=("parallel",),
            vmem_limit_bytes=32 * 1024 * 1024,
        ),
        **extra,
    )(o2d, t2d)

    loss_flat = loss2d.reshape(-1)
    if pad:
        loss_flat = loss_flat[:total]
    return loss_flat.reshape(orig_shape)


def _reference(output, target, label_smoothing):
    t = target.astype(jnp.float32) * (1.0 - label_smoothing) + 0.5 * label_smoothing
    o = output.astype(jnp.float32)
    log_o = jnp.maximum(jnp.log(o), -100.0)
    log_1mo = jnp.maximum(jnp.log(1.0 - o), -100.0)
    return (-(t * log_o + (1.0 - t) * log_1mo)).astype(output.dtype)


if __name__ == "__main__":
    key = jax.random.PRNGKey(0)
    k1, k2 = jax.random.split(key)
    ls = 0.1

    # Main case: NCHW probabilities + binary targets (numel divisible by 1024 -> no pad)
    B, C, H, W = 2, 4, 16, 16
    output = jax.nn.sigmoid(jax.random.normal(k1, (B, C, H, W), dtype=jnp.float32))
    target = (jax.random.uniform(k2, (B, C, H, W)) > 0.5).astype(jnp.float32)

    loss = jax.block_until_ready(label_smoothing_bce(output, target, ls))
    ref = _reference(output, target, ls)
    assert loss.shape == (B, C, H, W) and loss.dtype == output.dtype
    assert jnp.allclose(loss, ref, atol=1e-5, rtol=1e-5), "mismatch vs reference (main)"

    # Odd-size case: numel not a multiple of 128 -> minimal pad path
    k3, k4 = jax.random.split(k1)
    o2 = jax.nn.sigmoid(jax.random.normal(k3, (3, 5, 7), dtype=jnp.float32))
    t2 = (jax.random.uniform(k4, (3, 5, 7)) > 0.5).astype(jnp.float32)
    l2 = jax.block_until_ready(label_smoothing_bce(o2, t2, ls))
    assert jnp.allclose(l2, _reference(o2, t2, ls), atol=1e-5, rtol=1e-5), "mismatch (pad)"

    # Ragged-grid case: rows not a multiple of the block rows
    k5, k6 = jax.random.split(k2)
    o3 = jax.nn.sigmoid(jax.random.normal(k5, (40, 256), dtype=jnp.float32))
    t3 = (jax.random.uniform(k6, (40, 256)) > 0.5).astype(jnp.float32)
    l3 = jax.block_until_ready(label_smoothing_bce(o3, t3, ls, max_block_rows=8))
    assert jnp.allclose(l3, _reference(o3, t3, ls), atol=1e-5, rtol=1e-5), "mismatch (ragged)"

    print("KERNEL_OK")
</pallas_src>

<mosaic_0001>
module attributes {stable_mosaic.version = 11 : i64} {
  func.func @_bce_ls_kernel(%arg0: i32, %arg1: memref<2x1024xf32, #tpu.memory_space<vmem>>, %arg2: memref<2x1024xf32, #tpu.memory_space<vmem>>, %arg3: memref<2x1024xf32, #tpu.memory_space<vmem>>) attributes {dimension_semantics = [#tpu.dimension_semantics<parallel>], iteration_bounds = array<i64: 1>, scalar_prefetch = 0 : i64, scratch_operands = 0 : i64, tpu.core_type = #tpu.core_type<tc>, window_params = [{transform_indices = @transform_0, window_bounds = array<i64: 2, 1024>}, {transform_indices = @transform_1, window_bounds = array<i64: 2, 1024>}, {transform_indices = @transform_2, window_bounds = array<i64: 2, 1024>}]} {
    %c0 = arith.constant 0 : index
    %c0_0 = arith.constant 0 : index
    %0 = vector.load %arg1[%c0, %c0_0] : memref<2x1024xf32, #tpu.memory_space<vmem>>, vector<2x1024xf32>
    %c0_1 = arith.constant 0 : index
    %c0_2 = arith.constant 0 : index
    %1 = vector.load %arg2[%c0_1, %c0_2] : memref<2x1024xf32, #tpu.memory_space<vmem>>, vector<2x1024xf32>
    %cst = arith.constant 0.899999976 : f32
    %2 = vector.broadcast %cst : f32 to vector<2x1024xf32>
    %3 = arith.mulf %1, %2 : vector<2x1024xf32>
    %cst_3 = arith.constant 5.000000e-02 : f32
    %4 = vector.broadcast %cst_3 : f32 to vector<2x1024xf32>
    %5 = arith.addf %3, %4 : vector<2x1024xf32>
    %6 = math.log %0 : vector<2x1024xf32>
    %cst_4 = arith.constant -1.000000e+02 : f32
    %7 = vector.broadcast %cst_4 : f32 to vector<2x1024xf32>
    %8 = arith.maximumf %6, %7 : vector<2x1024xf32>
    %cst_5 = arith.constant 1.000000e+00 : f32
    %9 = vector.broadcast %cst_5 : f32 to vector<2x1024xf32>
    %10 = arith.subf %9, %0 : vector<2x1024xf32>
    %11 = math.log %10 : vector<2x1024xf32>
    %cst_6 = arith.constant -1.000000e+02 : f32
    %12 = vector.broadcast %cst_6 : f32 to vector<2x1024xf32>
    %13 = arith.maximumf %11, %12 : vector<2x1024xf32>
    %14 = arith.mulf %5, %8 : vector<2x1024xf32>
    %cst_7 = arith.constant 1.000000e+00 : f32
    %15 = vector.broadcast %cst_7 : f32 to vector<2x1024xf32>
    %16 = arith.subf %15, %5 : vector<2x1024xf32>
    %17 = arith.mulf %16, %13 : vector<2x1024xf32>
    %18 = arith.addf %14, %17 : vector<2x1024xf32>
    %cst_8 = arith.constant 0.000000e+00 : f32
    %19 = vector.broadcast %cst_8 : f32 to vector<2x1024xf32>
    %20 = arith.subf %19, %18 : vector<2x1024xf32>
    %c0_9 = arith.constant 0 : index
    %c0_10 = arith.constant 0 : index
    %21 = vector.load %arg3[%c0_9, %c0_10] : memref<2x1024xf32, #tpu.memory_space<vmem>>, vector<2x1024xf32>
    tpu.vector_store %arg3[%c0_9, %c0_10], %20 {strides = array<i32>} : memref<2x1024xf32, #tpu.memory_space<vmem>>, vector<2x1024xf32>,
    return
  }
  func.func @transform_0(%arg0: i32) -> (i32, i32) {
    %c0_i32 = arith.constant 0 : i32
    %c0_i32_0 = arith.constant 0 : i32
    return %arg0, %c0_i32 : i32, i32
  }
  func.func @transform_1(%arg0: i32) -> (i32, i32) {
    %c0_i32 = arith.constant 0 : i32
    %c0_i32_0 = arith.constant 0 : i32
    return %arg0, %c0_i32 : i32, i32
  }
  func.func @transform_2(%arg0: i32) -> (i32, i32) {
    %c0_i32 = arith.constant 0 : i32
    %c0_i32_0 = arith.constant 0 : i32
    return %arg0, %c0_i32 : i32, i32
  }
}

</mosaic_0001>

<bundles_post_ra>
// kernel: tpu_custom_call.1
= control target key start
LH: loop header
LB: loop body
LE: loop exit
PB: predicated region body
PF: predicated region fallthrough
CT: control target
= control target key end

     0   :  { %7 = vsyncpa [#allocation3], 0  ;;  %s223_s0 = inlined_call_operand.hbm [shape: f32[2,1024], index: 0, kind: input, shape index: {}]   ;;  %s224_s1 = inlined_call_operand.hbm [shape: f32[2,1024], index: 1, kind: input, shape index: {}]   ;;  %s225_s2 = inlined_call_operand.hbm [shape: f32[2,1024], index: 2, kind: output, shape index: {}]  }
   0x1   :  { %8 = vsyncpa [#allocation6], 0 }
   0x2   :  { %9 = vsyncpa [#allocation4], 0  ;;  %s169_s9 = smov [#allocation2]   ;;  %s170_s11 = smov [#allocation5]  }
   0x3   :  { %s16_s10 = sshll.u32 %s169_s9, 4  ;;  %s26_s12 = sshll.u32 %s170_s11, 4  ;;  %s17_s10 = int_to_ptr.vmem [resolvable:$true] %s16_s10  ;;  %s27_s12 = int_to_ptr.vmem [resolvable:$true] %s26_s12 }
   0x4   :  { %s97_s15 = scalar_lea.hbm %s223_s0, 256 }
   0x5   :  { %p98_p0 = scmp.ne.s32.totalorder %s223_s0, %s97_s15  ;;  %p101_p1 = scmp.lt.u32.totalorder %s97_s15, %s223_s0 }
   0x7   :  { %p103_p2 = pnand %p101_p1, %p98_p0 }
   0x9   :  { %106 = shalt.err (!%p103_p2)
}
   0xa   :  { %s107_s20 = scalar_lea.vmem %s17_s10, 256  ;;  %p112_p4 = scmp.lt.s32.totalorder %s17_s10, %s17_s10 }
   0xb   :  { %p108_p3 = scmp.ne.s32.totalorder %s17_s10, %s107_s20  ;;  %p113_p5 = scmp.lt.s32.totalorder %s107_s20, %s107_s20 }
   0xd   :  { %p114_p6 = por %p113_p5, %p112_p4 }
   0xf   :  { %p115_p7 = pnand %p114_p6, %p108_p3 }
  0x11   :  { %118 = shalt.err (!%p115_p7)
}
  0x12   :  { %19 = dma.hbm_to_vmem [thread:$0]  %s223_s0, 256, %s17_s10, [#allocation3]  }
  0x13   :  { %s119_s25 = scalar_lea.hbm %s224_s1, 256 }
  0x14   :  { %p120_p8 = scmp.ne.s32.totalorder %s224_s1, %s119_s25  ;;  %p123_p9 = scmp.lt.u32.totalorder %s119_s25, %s224_s1 }
  0x16   :  { %p125_p10 = pnand %p123_p9, %p120_p8 }
  0x18   :  { %128 = shalt.err (!%p125_p10)
}
  0x19   :  { %s129_s30 = scalar_lea.vmem %s27_s12, 256  ;;  %p134_p12 = scmp.lt.s32.totalorder %s27_s12, %s27_s12 }
  0x1a   :  { %p130_p11 = scmp.ne.s32.totalorder %s27_s12, %s129_s30  ;;  %p135_p13 = scmp.lt.s32.totalorder %s129_s30, %s129_s30 }
  0x1c   :  { %p136_p0 = por %p135_p13, %p134_p12 }
  0x1e   :  { %p137_p1 = pnand %p136_p0, %p130_p11 }
  0x20   :  { %140 = shalt.err (!%p137_p1)
}
  0x21   :  { %29 = dma.hbm_to_vmem [thread:$0]  %s224_s1, 256, %s27_s12, [#allocation6]  }
  0x22   :  { %163 = dma.done.wait [#allocation3], 256  }
  0x23   :  { %164 = vsyncadd [#allocation3], 4294967040 }
  0x24   :  { %165 = dma.done.wait [#allocation6], 256  }
  0x25   :  { %166 = vsyncadd [#allocation6], 4294967040  ;;  %v36_v0 = vld [vmem:[#allocation2] sm:$0xff]  ;;  %v37_v1 = vld [vmem:[#allocation2 + $0x8] sm:$0xff]  ;;  %s171_s1 = smov [#allocation7]  }
  0x26   :  { %89 = vlog2.f32 %v36_v0  ;;  %v50_v2 = vsub.f32 1.0, %v36_v0  ;;  %v51_v3 = vsub.f32 1.0, %v37_v1  ;;  %v38_v4 = vld [vmem:[#allocation5] sm:$0xff]  ;;  %v39_v5 = vld [vmem:[#allocation5 + $0x8] sm:$0xff]  ;;  %s76_s4 = sshll.u32 %s171_s1, 4  ;;  %s77_s4 = int_to_ptr.vmem [resolvable:$true] %s76_s4 }
  0x27   :  { %91 = vlog2.f32 %v37_v1  ;;  %v40_v6 = vmul.f32 0.9, %v38_v4  ;;  %v41_v7 = vmul.f32 0.9, %v39_v5  ;;  %s141_s5 = scalar_lea.vmem %s77_s4, 256  ;;  %p146_p3 = scmp.lt.s32.totalorder %s77_s4, %s77_s4 }
  0x28   :  { %93 = vlog2.f32 %v50_v2  ;;  %p142_p2 = scmp.ne.s32.totalorder %s77_s4, %s141_s5  ;;  %p147_p4 = scmp.lt.s32.totalorder %s141_s5, %s141_s5 }
  0x29   :  { %95 = vlog2.f32 %v51_v3  ;;  %v42_v8 = vadd.f32 0.05, %v40_v6  ;;  %v43_v10 = vadd.f32 0.05, %v41_v7 }
  0x2a   :  { %p148_p5 = por %p147_p4, %p146_p3 }
  0x2b   :  { %v60_v18 = vsub.f32 1.0, %v42_v8  ;;  %v61_v21 = vsub.f32 1.0, %v43_v10 }
  0x2c   :  { %p149_p6 = pnand %p148_p5, %p142_p2 }
  0x30   :  { %v90_v9 = vpop.eup %89 }
  0x31   :  { %v92_v11 = vpop.eup %91  ;;  %v45_v12 = vmul.f32 0.6931472, %v90_v9 }
  0x32   :  { %v94_v13 = vpop.eup %93  ;;  %v47_v14 = vmul.f32 0.6931472, %v92_v11 }
  0x33   :  { %v96_v15 = vpop.eup %95  ;;  %v48_v16 = vmax.f32 %v45_v12, -100.0  ;;  %v53_v17 = vmul.f32 0.6931472, %v94_v13 }
  0x34   :  { %v49_v19 = vmax.f32 %v47_v14, -100.0  ;;  %v55_v20 = vmul.f32 0.6931472, %v96_v15 }
  0x35   :  { %v56_v22 = vmax.f32 %v53_v17, -100.0  ;;  %v58_v23 = vmul.f32 %v48_v16, %v42_v8 }
  0x36   :  { %v57_v24 = vmax.f32 %v55_v20, -100.0  ;;  %v59_v25 = vmul.f32 %v49_v19, %v43_v10 }
  0x37   :  { %v62_v26 = vmul.f32 %v60_v18, %v56_v22 }
  0x38   :  { %v63_v27 = vmul.f32 %v61_v21, %v57_v24 }
  0x39   :  { %v64_v28 = vadd.f32 %v62_v26, %v58_v23 }
  0x3a   :  { %v65_v29 = vadd.f32 %v63_v27, %v59_v25 }
  0x3b   :  { %v66_v30 = vsub.f32 0.0, %v64_v28 }
  0x3c   :  { %v67_v31 = vsub.f32 0.0, %v65_v29 }
  0x3d   :  { %68 = vst [vmem:[#allocation7] sm:$0xff] %v66_v30 }
  0x3e   :  { %69 = vst [vmem:[#allocation7 + $0x8] sm:$0xff] %v67_v31 }
  0x3f   :  { %152 = shalt.err (!%p149_p6)
}
  0x40   :  { %s153_s8 = scalar_lea.hbm %s225_s2, 256 }
  0x41   :  { %p154_p7 = scmp.ne.s32.totalorder %s225_s2, %s153_s8  ;;  %p157_p8 = scmp.lt.u32.totalorder %s153_s8, %s225_s2 }
  0x43   :  { %p159_p9 = pnand %p157_p8, %p154_p7 }
  0x45   :  { %162 = shalt.err (!%p159_p9)
}
  0x46   :  { %79 = dma.vmem_to_hbm [thread:$0]  %s77_s4, 256, %s225_s2, [#allocation4]  }
  0x47   :  { %167 = dma.done.wait [#allocation4], 256  }
  0x48   :  { %168 = vsyncadd [#allocation4], 4294967040 }
  0x49   :  { %83 = vsyncpa [#allocation3], 1 }
  0x4a   :  { %84 = vsyncpa [#allocation6], 1 }
  0x4b   :  { %85 = vsyncpa [#allocation4], 1 }

</bundles_post_ra>
